<compile_context>
chip_gen: v5e
topology: v5e:2x2
jax: 0.10.0
libtpu: 0.0.40
codegen_flags: <defaults>
</compile_context>

<pallas_src>
import functools

import jax
import jax.numpy as jnp
from jax.experimental import pallas as pl
from jax.experimental.pallas import tpu as pltpu

GAMMA = 1.5
ALPHA = 0.25

LANES = 128
SUBLANES_F32 = 8      # f32 vreg sublane count (accumulator block height)
CHUNK_ROWS = 64       # in-kernel compute chunk: 8 f32 vregs per operand


def _round_up(x, m):
    return (x + m - 1) // m * m


def _device_kind():
    try:
        return jax.devices()[0].device_kind.lower()
    except Exception:
        return ""


def _focal_loss_kernel(pred_ref, true_ref, out_ref, *, gamma, alpha,
                       row_block, n_valid, needs_mask):
    split = pl.program_id(0)
    step = pl.program_id(1)

    @pl.when(step == 0)
    def _():
        out_ref[...] = jnp.zeros_like(out_ref)

    # Global flat element offset of this block (scalar-unit arithmetic only).
    block_base = (split * pl.num_programs(1) + step) * (row_block * LANES)

    if needs_mask:
        # Flat element index within a chunk; hoisted so the broadcast is built once.
        local_idx = (
            jax.lax.broadcasted_iota(jnp.int32, (CHUNK_ROWS, LANES), 0) * LANES
            + jax.lax.broadcasted_iota(jnp.int32, (CHUNK_ROWS, LANES), 1))

    one_m_alpha = 1.0 - alpha
    two_alpha_m1 = 2.0 * alpha - 1.0

    @pl.loop(0, row_block // CHUNK_ROWS)
    def _(c):
        r0 = pl.multiple_of(c * CHUNK_ROWS, CHUNK_ROWS)
        x = pred_ref[pl.ds(r0, CHUNK_ROWS), :].astype(jnp.float32)
        y = true_ref[pl.ds(r0, CHUNK_ROWS), :].astype(jnp.float32)

        # sigmoid via a single EUP op (tanh); BCE softplus term via one log whose
        # argument sigmoid(|x|) lies in [0.5, 1)  -> numerically stable, no log(0).
        p = 0.5 * (1.0 + jnp.tanh(0.5 * x))
        p_big = jnp.where(x >= 0.0, p, 1.0 - p)           # = sigmoid(|x|)
        bce = jnp.maximum(x, 0.0) - x * y - jnp.log(p_big)

        # t = 1 - p_t and alpha_factor in fused form (constants fold at trace time).
        t = jnp.maximum(p + y * (1.0 - 2.0 * p), 0.0)
        alpha_factor = one_m_alpha + y * two_alpha_m1
        if gamma == 1.5:
            mod = t * jnp.sqrt(t)                          # avoids pow() = exp + log
        elif gamma == 2.0:
            mod = t * t
        elif gamma == 1.0:
            mod = t
        else:
            mod = t ** gamma
        loss = bce * (alpha_factor * mod)

        if needs_mask:
            # Mask the ragged tail (and any clamped duplicate block) in-kernel; no
            # padded copies of pred/true are ever materialized in HBM.
            rem = n_valid - (block_base + r0 * LANES)
            loss = jnp.where(local_idx < rem, loss, 0.0)

        # Fold the chunk into the resident per-split (8, 128) accumulator
        # (7 pure-VALU vreg adds; the single cross-lane reduce lives in the wrapper).
        out_ref[...] += jnp.sum(loss.reshape(-1, SUBLANES_F32, LANES), axis=0)


def focal_loss(pred, true, gamma=GAMMA, alpha=ALPHA, reduction="mean"):
    """Focal loss on a BCE-with-logits base; reduction in {'mean', 'sum'}."""
    assert pred.shape == true.shape
    n_valid = int(pred.size)
    if n_valid == 0:
        return jnp.float32(0.0) if reduction == "sum" else jnp.float32(jnp.nan)

    # pred: keep floating dtype native (bf16 stays bf16), otherwise upcast to f32.
    if not jnp.issubdtype(pred.dtype, jnp.floating):
        pred = pred.astype(jnp.float32)
    # true: floats stay native; int/bool ship as int8 (1 B/elem) and cast in-kernel.
    if not jnp.issubdtype(true.dtype, jnp.floating) and true.dtype != jnp.int8:
        true = true.astype(jnp.int8)

    pred_f = pred.reshape(-1)
    true_f = true.reshape(-1)

    # Pad only to a multiple of the 128-lane width so a lane-dense 2-D view exists.
    # In the common case (numel % 128 == 0) this is a no-op. Tail correctness comes from
    # the in-kernel mask, not from the pad values.
    lane_pad = (-n_valid) % LANES
    if lane_pad:
        pred_f = jnp.pad(pred_f, (0, lane_pad))
        true_f = jnp.pad(true_f, (0, lane_pad))
    n_rows = (n_valid + lane_pad) // LANES

    pred2 = pred_f.reshape(n_rows, LANES)
    true2 = true_f.reshape(n_rows, LANES)

    # Generation-aware tiling / core parallelism.
    kind = _device_kind()
    is_v7 = "v7" in kind
    is_v6 = "v6" in kind
    max_row_block = 4096 if (is_v7 or is_v6) else 2048   # v5e scoped-VMEM default = 16 MiB
    num_splits = 2 if is_v7 else 1                        # 2 TensorCores per chip on v7x

    rows_per_split = -(-n_rows // num_splits)
    row_block = min(max_row_block,
                    _round_up(max(rows_per_split, CHUNK_ROWS), CHUNK_ROWS))
    steps = max(1, -(-rows_per_split // row_block))
    last_block = (n_rows - 1) // row_block         # last (possibly partial) valid block
    needs_mask = (num_splits * steps * row_block * LANES) != n_valid

    def in_index(c, i):
        # Clamp so no block is entirely out of bounds; clamped blocks are fully masked.
        return (jnp.minimum(c * steps + i, last_block), 0)

    in_blk = pl.BlockSpec((row_block, LANES), in_index)
    out_blk = pl.BlockSpec((SUBLANES_F32, LANES), lambda c, i: (c, 0))

    if is_v7:
        dim_sems = (pltpu.CORE_PARALLEL, pltpu.ARBITRARY)
    else:
        dim_sems = (pltpu.PARALLEL, pltpu.ARBITRARY)

    kernel = functools.partial(_focal_loss_kernel, gamma=gamma, alpha=alpha,
                               row_block=row_block, n_valid=n_valid,
                               needs_mask=needs_mask)

    bytes_accessed = (pred2.size * pred2.dtype.itemsize
                      + true2.size * true2.dtype.itemsize
                      + num_splits * SUBLANES_F32 * LANES * 4)
    cost = pl.CostEstimate(flops=20 * n_valid, transcendentals=3 * n_valid,
                           bytes_accessed=bytes_accessed)

    partials = pl.pallas_call(
        kernel,
        out_shape=jax.ShapeDtypeStruct((num_splits * SUBLANES_F32, LANES), jnp.float32),
        grid_spec=pltpu.PrefetchScalarGridSpec(
            num_scalar_prefetch=0,
            grid=(num_splits, steps),
            in_specs=[in_blk, in_blk],
            out_specs=out_blk,
        ),
        compiler_params=pltpu.CompilerParams(dimension_semantics=dim_sems),
        cost_estimate=cost,
    )(pred2, true2)

    total = jnp.sum(partials)
    if reduction == "mean":
        return total / jnp.float32(n_valid)
    if reduction == "sum":
        return total
    # TODO(synk): reduction='none' (full elementwise map output) not implemented.
    raise NotImplementedError("focal_loss: reduction='none' is not implemented")


def _reference_focal_loss(pred, true, gamma=GAMMA, alpha=ALPHA):
    pred = pred.astype(jnp.float32)
    true = true.astype(jnp.float32)
    bce = jnp.maximum(pred, 0.0) - pred * true + jnp.log1p(jnp.exp(-jnp.abs(pred)))
    p = jax.nn.sigmoid(pred)
    p_t = true * p + (1 - true) * (1 - p)
    alpha_factor = true * alpha + (1 - true) * (1 - alpha)
    mod = (1.0 - p_t) ** gamma
    return jnp.mean(bce * alpha_factor * mod)


if __name__ == "__main__":
    key = jax.random.PRNGKey(0)
    k1, k2 = jax.random.split(key)
    # NCHW logits and binary targets, as the PyTorch module would receive.
    pred = jax.random.normal(k1, (2, 4, 16, 16), dtype=jnp.float32) * 2.0
    true = (jax.random.uniform(k2, (2, 4, 16, 16)) > 0.5).astype(jnp.float32)

    out = focal_loss(pred, true)
    jax.block_until_ready(out)

    ref = _reference_focal_loss(pred, true)
    assert jnp.allclose(out, ref, rtol=2e-4, atol=1e-6), (out, ref)
    print("KERNEL_OK")
</pallas_src>

<mosaic_0001>
module attributes {stable_mosaic.version = 11 : i64} {
  func.func @_focal_loss_kernel(%arg0: i32, %arg1: i32, %arg2: memref<64x128xf32, #tpu.memory_space<vmem>>, %arg3: memref<64x128xf32, #tpu.memory_space<vmem>>, %arg4: memref<8x128xf32, #tpu.memory_space<vmem>>) attributes {dimension_semantics = [#tpu.dimension_semantics<parallel>, #tpu.dimension_semantics<arbitrary>], iteration_bounds = array<i64: 1, 1>, scalar_prefetch = 0 : i64, scratch_operands = 0 : i64, tpu.core_type = #tpu.core_type<tc>, window_params = [{transform_indices = @transform_0, window_bounds = array<i64: 64, 128>}, {transform_indices = @transform_1, window_bounds = array<i64: 64, 128>}, {transform_indices = @transform_2, window_bounds = array<i64: 8, 128>}]} {
    %c0_i32 = arith.constant 0 : i32
    %0 = arith.cmpi eq, %arg1, %c0_i32 : i32
    %1 = arith.extui %0 : i1 to i32
    %c0_i32_0 = arith.constant 0 : i32
    %2 = arith.cmpi ne, %1, %c0_i32_0 : i32
    scf.if %2 {
      %cst_23 = arith.constant 0.000000e+00 : f32
      %65 = vector.broadcast %cst_23 : f32 to vector<8x128xf32>
      %c0_24 = arith.constant 0 : index
      %c0_25 = arith.constant 0 : index
      %66 = vector.load %arg4[%c0_24, %c0_25] : memref<8x128xf32, #tpu.memory_space<vmem>>, vector<8x128xf32>
      tpu.vector_store %arg4[%c0_24, %c0_25], %65 {strides = array<i32>} : memref<8x128xf32, #tpu.memory_space<vmem>>, vector<8x128xf32>,
    } else {
    }
    %c1_i32 = arith.constant 1 : i32
    %3 = arith.muli %arg0, %c1_i32 : i32
    %4 = arith.addi %3, %arg1 : i32
    %c8192_i32 = arith.constant 8192 : i32
    %5 = arith.muli %4, %c8192_i32 : i32
    %6 = tpu.iota {dimensions = array<i32: 0>} : vector<64x128xi32>
    %c128_i32 = arith.constant 128 : i32
    %7 = vector.broadcast %c128_i32 : i32 to vector<64x128xi32>
    %8 = arith.muli %6, %7 : vector<64x128xi32>
    %9 = tpu.iota {dimensions = array<i32: 1>} : vector<64x128xi32>
    %10 = arith.addi %8, %9 : vector<64x128xi32>
    %c0_i32_1 = arith.constant 0 : i32
    %c1_i32_2 = arith.constant 1 : i32
    %11 = arith.muli %c0_i32_1, %c1_i32_2 : i32
    %c0_i32_3 = arith.constant 0 : i32
    %12 = arith.addi %c0_i32_3, %11 : i32
    %c64_i32 = arith.constant 64 : i32
    %13 = arith.muli %12, %c64_i32 : i32
    %14 = tpu.assume_multiple %13, 64 : i32
    %15 = arith.index_cast %14 : i32 to index
    %c0 = arith.constant 0 : index
    %16 = vector.load %arg2[%15, %c0] : memref<64x128xf32, #tpu.memory_space<vmem>>, vector<64x128xf32>
    %17 = arith.index_cast %14 : i32 to index
    %c0_4 = arith.constant 0 : index
    %18 = vector.load %arg3[%17, %c0_4] : memref<64x128xf32, #tpu.memory_space<vmem>>, vector<64x128xf32>
    %cst = arith.constant 5.000000e-01 : f32
    %19 = vector.broadcast %cst : f32 to vector<64x128xf32>
    %20 = arith.mulf %19, %16 : vector<64x128xf32>
    %21 = math.tanh %20 : vector<64x128xf32>
    %cst_5 = arith.constant 1.000000e+00 : f32
    %22 = vector.broadcast %cst_5 : f32 to vector<64x128xf32>
    %23 = arith.addf %22, %21 : vector<64x128xf32>
    %cst_6 = arith.constant 5.000000e-01 : f32
    %24 = vector.broadcast %cst_6 : f32 to vector<64x128xf32>
    %25 = arith.mulf %24, %23 : vector<64x128xf32>
    %cst_7 = arith.constant 0.000000e+00 : f32
    %26 = vector.broadcast %cst_7 : f32 to vector<64x128xf32>
    %27 = arith.cmpf oge, %16, %26 : vector<64x128xf32>
    %cst_8 = arith.constant 1.000000e+00 : f32
    %28 = vector.broadcast %cst_8 : f32 to vector<64x128xf32>
    %29 = arith.subf %28, %25 : vector<64x128xf32>
    %30 = arith.select %27, %25, %29 : vector<64x128xi1>, vector<64x128xf32>
    %cst_9 = arith.constant 0.000000e+00 : f32
    %31 = vector.broadcast %cst_9 : f32 to vector<64x128xf32>
    %32 = arith.maximumf %16, %31 : vector<64x128xf32>
    %33 = arith.mulf %16, %18 : vector<64x128xf32>
    %34 = arith.subf %32, %33 : vector<64x128xf32>
    %35 = math.log %30 : vector<64x128xf32>
    %36 = arith.subf %34, %35 : vector<64x128xf32>
    %cst_10 = arith.constant 2.000000e+00 : f32
    %37 = vector.broadcast %cst_10 : f32 to vector<64x128xf32>
    %38 = arith.mulf %37, %25 : vector<64x128xf32>
    %cst_11 = arith.constant 1.000000e+00 : f32
    %39 = vector.broadcast %cst_11 : f32 to vector<64x128xf32>
    %40 = arith.subf %39, %38 : vector<64x128xf32>
    %41 = arith.mulf %18, %40 : vector<64x128xf32>
    %42 = arith.addf %25, %41 : vector<64x128xf32>
    %cst_12 = arith.constant 0.000000e+00 : f32
    %43 = vector.broadcast %cst_12 : f32 to vector<64x128xf32>
    %44 = arith.maximumf %42, %43 : vector<64x128xf32>
    %cst_13 = arith.constant -5.000000e-01 : f32
    %45 = vector.broadcast %cst_13 : f32 to vector<64x128xf32>
    %46 = arith.mulf %18, %45 : vector<64x128xf32>
    %cst_14 = arith.constant 7.500000e-01 : f32
    %47 = vector.broadcast %cst_14 : f32 to vector<64x128xf32>
    %48 = arith.addf %47, %46 : vector<64x128xf32>
    %49 = math.sqrt %44 : vector<64x128xf32>
    %50 = arith.mulf %44, %49 : vector<64x128xf32>
    %51 = arith.mulf %48, %50 : vector<64x128xf32>
    %52 = arith.mulf %36, %51 : vector<64x128xf32>
    %c128_i32_15 = arith.constant 128 : i32
    %53 = arith.muli %14, %c128_i32_15 : i32
    %54 = arith.addi %5, %53 : i32
    %c2048_i32 = arith.constant 2048 : i32
    %55 = arith.subi %c2048_i32, %54 : i32
    %56 = vector.broadcast %55 : i32 to vector<64x128xi32>
    %57 = arith.cmpi slt, %10, %56 : vector<64x128xi32>
    %cst_16 = arith.constant 0.000000e+00 : f32
    %58 = vector.broadcast %cst_16 : f32 to vector<64x128xf32>
    %59 = arith.select %57, %52, %58 : vector<64x128xi1>, vector<64x128xf32>
    %c0_17 = arith.constant 0 : index
    %c0_18 = arith.constant 0 : index
    %60 = vector.load %arg4[%c0_17, %c0_18] : memref<8x128xf32, #tpu.memory_space<vmem>>, vector<8x128xf32>
    %61 = vector.shape_cast %59 : vector<64x128xf32> to vector<8x8x128xf32>
    %cst_19 = arith.constant dense<0.000000e+00> : vector<8x128xf32>
    %62 = vector.multi_reduction <add>, %61, %cst_19 [0] : vector<8x8x128xf32> to vector<8x128xf32>
    %63 = arith.addf %60, %62 : vector<8x128xf32>
    %c0_20 = arith.constant 0 : index
    %c0_21 = arith.constant 0 : index
    %64 = vector.load %arg4[%c0_20, %c0_21] : memref<8x128xf32, #tpu.memory_space<vmem>>, vector<8x128xf32>
    tpu.vector_store %arg4[%c0_20, %c0_21], %63 {strides = array<i32>} : memref<8x128xf32, #tpu.memory_space<vmem>>, vector<8x128xf32>,
    %c1_i32_22 = arith.constant 1 : i32
    return
  }
  func.func @transform_0(%arg0: i32, %arg1: i32) -> (i32, i32) {
    %c1_i32 = arith.constant 1 : i32
    %0 = arith.muli %arg0, %c1_i32 : i32
    %1 = arith.addi %0, %arg1 : i32
    %c0_i32 = arith.constant 0 : i32
    %2 = arith.minsi %1, %c0_i32 : i32
    %c0_i32_0 = arith.constant 0 : i32
    %c0_i32_1 = arith.constant 0 : i32
    return %2, %c0_i32_0 : i32, i32
  }
  func.func @transform_1(%arg0: i32, %arg1: i32) -> (i32, i32) {
    %c1_i32 = arith.constant 1 : i32
    %0 = arith.muli %arg0, %c1_i32 : i32
    %1 = arith.addi %0, %arg1 : i32
    %c0_i32 = arith.constant 0 : i32
    %2 = arith.minsi %1, %c0_i32 : i32
    %c0_i32_0 = arith.constant 0 : i32
    %c0_i32_1 = arith.constant 0 : i32
    return %2, %c0_i32_0 : i32, i32
  }
  func.func @transform_2(%arg0: i32, %arg1: i32) -> (i32, i32) {
    %c0_i32 = arith.constant 0 : i32
    %c0_i32_0 = arith.constant 0 : i32
    return %arg0, %c0_i32 : i32, i32
  }
}

</mosaic_0001>

<bundles_post_ra>
// kernel: tpu_custom_call.1
= control target key start
LH: loop header
LB: loop body
LE: loop exit
PB: predicated region body
PF: predicated region fallthrough
CT: control target
= control target key end

     0   :  { %7 = vsyncpa [#allocation3], 0  ;;  %s1050_s0 = inlined_call_operand.hbm [shape: f32[16,128], index: 0, kind: input, shape index: {}]   ;;  %s1051_s1 = inlined_call_operand.hbm [shape: f32[16,128], index: 1, kind: input, shape index: {}]   ;;  %s1052_s2 = inlined_call_operand.hbm [shape: f32[8,128], index: 2, kind: output, shape index: {}]  }
   0x1   :  { %8 = vsyncpa [#allocation6], 0 }
   0x2   :  { %9 = vsyncpa [#allocation4], 0 }
   0x3   :  { %20 = vsyncadd [#allocation3], 768  ;;  %s25_s11 = sshll.u32 %s1050_s0, 4  ;;  %s592_s12 = smov [#allocation2]   ;;  %s26_s11 = int_to_ptr.hbm [resolvable:$true] %s25_s11 }
   0x4   :  { %s27_s13 = sshll.u32 %s592_s12, 4  ;;  %s593_s14 = smov 128   ;;  %s28_s13 = int_to_ptr.vmem [resolvable:$true] %s27_s13 }
   0x5   :  { %s594_s15 = smov 8  }
   0x6   :  { %33 = dma.hbm_to_vmem [thread:$0]  %s26_s11, 256, %s28_s13, [#allocation3], %s593_s14, %s593_s14, %s594_s15  }
   0x7   :  { %44 = vsyncadd [#allocation6], 768  ;;  %s49_s18 = sshll.u32 %s1051_s1, 4  ;;  %s595_s19 = smov [#allocation5]   ;;  %s50_s18 = int_to_ptr.hbm [resolvable:$true] %s49_s18 }
   0x8   :  { %s51_s20 = sshll.u32 %s595_s19, 4  ;;  %s52_s20 = int_to_ptr.vmem [resolvable:$true] %s51_s20 }
   0x9   :  { %57 = dma.hbm_to_vmem [thread:$0]  %s50_s18, 256, %s52_s20, [#allocation6], %s593_s14, %s593_s14, %s594_s15  }
   0xa   :  { %586 = dma.done.wait [#allocation3], 1024  }
   0xb   :  { %587 = vsyncadd [#allocation3], 4294966272 }
   0xc   :  { %588 = dma.done.wait [#allocation6], 1024  }
   0xd   :  { %589 = vsyncadd [#allocation6], 4294966272  ;;  %v85_v0 = vlaneseq  ;;  %v618_v2 = vld [vmem:[#allocation2] sm:$0xff]  ;;  %v620_v3 = vld [vmem:[#allocation2 + $0x8] sm:$0xff]  ;;  %s596_s0 = smov [#allocation7]   ;;  %s445_s23 = sshll.u32 %s1052_s2, 4  ;;  %s446_s23 = int_to_ptr.hbm [resolvable:$true] %s445_s23 }
   0xe   :  { %v622_v4 = vld [vmem:[#allocation2 + $0x10] sm:$0xff]  ;;  %v624_v5 = vld [vmem:[#allocation2 + $0x18] sm:$0xff]  ;;  %v626_v6 = vld [vmem:[#allocation2 + $0x20] sm:$0xff]  ;;  %v128_v8 = vmul.f32 0.5, %v618_v2  ;;  %v129_v10 = vmul.f32 0.5, %v620_v3  ;;  %vm160_vm0 = vcmp.ge.f32.partialorder %v618_v2, 0.0 }
   0xf   :  { %v86_v1 = vshrl.u32 %v85_v0, 7  ;;  %v628_v7 = vld [vmem:[#allocation2 + $0x28] sm:$0xff]  ;;  %v631_v9 = vld [vmem:[#allocation2 + $0x30] sm:$0xff]  ;;  %v130_v11 = vmul.f32 0.5, %v622_v4  ;;  %v131_v12 = vmul.f32 0.5, %v624_v5  ;;  %v132_v14 = vmul.f32 0.5, %v626_v6 }
  0x10   :  { %466 = vtanh.f32 %v128_v8  ;;  %v637_v17 = vld [vmem:[#allocation2 + $0x38] sm:$0xff]  ;;  %v133_v18 = vmul.f32 0.5, %v628_v7  ;;  %v134_v21 = vmul.f32 0.5, %v631_v9  ;;  %v641_v22 = vand.u32 127, %v85_v0  ;;  %v668_v46 = vld [vmem:[#allocation5] sm:$0xff]  ;;  %v690_v0 = vld [vmem:[#allocation5 + $0x8] sm:$0xff] }
  0x11   :  { %v87_v13 = vadd.s32 8, %v86_v1  ;;  %v88_v15 = vadd.s32 16, %v86_v1  ;;  %v89_v16 = vadd.s32 24, %v86_v1  ;;  %468 = vtanh.f32 %v129_v10  ;;  %s443_s1 = sshll.u32 %s596_s0, 4  ;;  %s444_s1 = int_to_ptr.vmem [resolvable:$true] %s443_s1 }
  0x12   :  { %v90_v19 = vadd.s32 32, %v86_v1  ;;  %v91_v20 = vadd.s32 40, %v86_v1  ;;  %470 = vtanh.f32 %v130_v11  ;;  %1059 = vst [vmem:[#allocation11_spill] sm:$0xff] %v641_v22  ;;  %v643_v23 = vadd.s32 48, %v86_v1 }
  0x13   :  { %472 = vtanh.f32 %v131_v12  ;;  %v645_v24 = vadd.s32 56, %v86_v1  ;;  %v135_v25 = vmul.f32 0.5, %v637_v17  ;;  %v94_v26 = vmul.u32 128, %v86_v1  ;;  %v692_v1 = vld [vmem:[#allocation5 + $0x10] sm:$0xff] }
  0x14   :  { %1060 = vst [vmem:[#allocation12_spill] sm:$0xff] %v643_v23  ;;  %474 = vtanh.f32 %v132_v14  ;;  %v95_v27 = vmul.u32 128, %v87_v13  ;;  %v96_v28 = vmul.u32 128, %v88_v15  ;;  %v97_v30 = vmul.u32 128, %v89_v16  ;;  %v698_v13 = vld [vmem:[#allocation5 + $0x18] sm:$0xff] }
  0x15   :  { %1061 = vst [vmem:[#allocation13_spill] sm:$0xff] %v645_v24  ;;  %476 = vtanh.f32 %v133_v18  ;;  %v98_v31 = vmul.u32 128, %v90_v19  ;;  %v99_v32 = vmul.u32 128, %v91_v20  ;;  %v651_v38 = vadd.s32 %v641_v22, %v94_v26  ;;  %v706_v19 = vld [vmem:[#allocation5 + $0x20] sm:$0xff]  ;;  %v708_v20 = vld [vmem:[#allocation5 + $0x28] sm:$0xff] }
  0x16   :  { %v467_v29 = vpop.eup %466  ;;  %478 = vtanh.f32 %v134_v21  ;;  %v654_v39 = vadd.s32 %v641_v22, %v95_v27  ;;  %v657_v40 = vadd.s32 %v641_v22, %v96_v28  ;;  %v660_v43 = vadd.s32 %v641_v22, %v97_v30 }
  0x17   :  { %v469_v33 = vpop.eup %468  ;;  %480 = vtanh.f32 %v135_v25  ;;  %v144_v41 = vadd.f32 1.0, %v467_v29  ;;  %v663_v44 = vadd.s32 %v641_v22, %v98_v31  ;;  %v666_v45 = vadd.s32 %v641_v22, %v99_v32  ;;  %v724_v32 = vld [vmem:[#allocation5 + $0x30] sm:$0xff] }
  0x18   :  { %v471_v34 = vpop.eup %470  ;;  %v145_v47 = vadd.f32 1.0, %v469_v33  ;;  %vm161_vm1 = vcmp.ge.f32.partialorder %v620_v3, 0.0  ;;  %v674_v50 = vmul.f32 %v668_v46, %v618_v2  ;;  %vm162_vm2 = vcmp.ge.f32.partialorder %v622_v4, 0.0 }
  0x19   :  { %v473_v37 = vpop.eup %472  ;;  %1062 = vst [vmem:[#allocation14_spill] sm:$0xff] %v663_v44  ;;  %v146_v49 = vadd.f32 1.0, %v471_v34  ;;  %v184_v52 = vmax.f32 %v618_v2, 0.0  ;;  %v185_v53 = vmax.f32 %v620_v3, 0.0  ;;  %v680_v56 = vmul.f32 0.5, %v144_v41 }
  0x1a   :  { %v475_v42 = vpop.eup %474  ;;  %1063 = vst [vmem:[#allocation15_spill] sm:$0xff] %v666_v45  ;;  %v147_v55 = vadd.f32 1.0, %v473_v37  ;;  %vm163_vm3 = vcmp.ge.f32.partialorder %v624_v5, 0.0  ;;  %v685_v61 = vmul.f32 0.5, %v145_v47  ;;  %vm164_vm4 = vcmp.ge.f32.partialorder %v626_v6, 0.0 }
  0x1b   :  { %v477_v48 = vpop.eup %476  ;;  %v148_v60 = vadd.f32 1.0, %v475_v42  ;;  %v694_v11 = vmul.f32 0.5, %v146_v49  ;;  %vm165_vm5 = vcmp.ge.f32.partialorder %v628_v7, 0.0  ;;  %v168_v12 = vsub.f32 1.0, %v680_v56 }
  0x1c   :  { %v479_v51 = vpop.eup %478  ;;  %v149_v8 = vadd.f32 1.0, %v477_v48  ;;  %v169_v14 = vsub.f32 1.0, %v685_v61  ;;  %v193_v16 = vmul.f32 %v690_v0, %v620_v3  ;;  %v194_v18 = vmul.f32 %v692_v1, %v622_v4 }
  0x1d   :  { %v481_v59 = vpop.eup %480  ;;  %v150_v10 = vadd.f32 1.0, %v479_v51  ;;  %v710_v25 = vmul.f32 0.5, %v147_v55  ;;  %v170_v26 = vsub.f32 1.0, %v694_v11  ;;  %v195_v27 = vmul.f32 %v698_v13, %v624_v5 }
  0x1e   :  { %v151_v21 = vadd.f32 1.0, %v481_v59  ;;  %v715_v28 = vmul.f32 0.5, %v148_v60  ;;  %v196_v29 = vmul.f32 %v706_v19, %v626_v6  ;;  %v721_v30 = vmul.f32 %v708_v20, %v628_v7 }
  0x1f   :  { %v232_v31 = vmul.f32 2.0, %v680_v56  ;;  %v726_v33 = vmul.f32 0.5, %v149_v8  ;;  %v728_v34 = vmul.f32 0.5, %v150_v10  ;;  %vm166_vm6 = vcmp.ge.f32.partialorder %v631_v9, 0.0 }
  0x20   :  { %v176_v37 = vsel %vm160_vm0, %v680_v56, %v168_v12  ;;  %v233_v41 = vmul.f32 2.0, %v685_v61  ;;  %v171_v42 = vsub.f32 1.0, %v710_v25  ;;  %v177_v47 = vsel %vm161_vm1, %v685_v61, %v169_v14  ;;  %v752_v14 = vld [vmem:[#allocation5 + $0x38] sm:$0xff] }
  0x21   :  { %v198_v48 = vmul.f32 %v724_v32, %v631_v9  ;;  %v234_v49 = vmul.f32 2.0, %v694_v11  ;;  %v742_v51 = vmul.f32 0.5, %v151_v21  ;;  %vm167_vm7 = vcmp.ge.f32.partialorder %v637_v17, 0.0 }
  0x22   :  { %v172_v55 = vsub.f32 1.0, %v715_v28  ;;  %v178_v59 = vsel %vm162_vm2, %v694_v11, %v170_v26  ;;  %v235_v60 = vmul.f32 2.0, %v710_v25  ;;  %v173_v8 = vsub.f32 1.0, %v726_v33 }
  0x23   :  { %482 = vlog2.f32 %v176_v37  ;;  %v236_v10 = vmul.f32 2.0, %v715_v28  ;;  %v240_v12 = vsub.f32 1.0, %v232_v31  ;;  %v237_v21 = vmul.f32 2.0, %v726_v33 }
  0x24   :  { %484 = vlog2.f32 %v177_v47  ;;  %v238_v36 = vmul.f32 2.0, %v728_v34  ;;  %v241_v35 = vsub.f32 1.0, %v233_v41  ;;  %v179_v26 = vsel %vm163_vm3, %v710_v25, %v171_v42 }
  0x25   :  { %v199_v15 = vmul.f32 %v752_v14, %v637_v17  ;;  %486 = vlog2.f32 %v178_v59  ;;  %v242_v37 = vsub.f32 1.0, %v234_v49  ;;  %v174_v63 = vsub.f32 1.0, %v728_v34 }
  0x26   :  { %v180_v31 = vsel %vm164_vm4, %v715_v28, %v172_v55  ;;  %v768_v47 = vsub.f32 %v184_v52, %v674_v50  ;;  %v243_v41 = vsub.f32 1.0, %v235_v60  ;;  %v181_v42 = vsel %vm165_vm5, %v726_v33, %v173_v8 }
  0x27   :  { %v239_v62 = vmul.f32 2.0, %v742_v51  ;;  %v244_v59 = vsub.f32 1.0, %v236_v10  ;;  %v248_v49 = vmul.f32 %v240_v12, %v668_v46  ;;  %488 = vlog2.f32 %v179_v26 }
  0x28   :  { %v245_v58 = vsub.f32 1.0, %v237_v21  ;;  %v246_v57 = vsub.f32 1.0, %v238_v36  ;;  %v249_v55 = vmul.f32 %v241_v35, %v690_v0  ;;  %v175_v2 = vsub.f32 1.0, %v742_v51 }
  0x29   :  { %v483_v54 = vpop.eup %482  ;;  %v779_v50 = vsub.f32 %v185_v53, %v193_v16  ;;  %490 = vlog2.f32 %v180_v31  ;;  %v250_v52 = vmul.f32 %v242_v37, %v692_v1  ;;  %v1064_v8 = vmax.f32 %v622_v4, 0.0 }
  0x2a   :  { %v485_v60 = vpop.eup %484  ;;  %v1065_v12 = vmax.f32 %v624_v5, 0.0  ;;  %492 = vlog2.f32 %v181_v42  ;;  %v251_v35 = vmul.f32 %v243_v41, %v698_v13  ;;  %v182_v3 = vsel %vm166_vm6, %v728_v34, %v174_v63 }
  0x2b   :  { %v784_v10 = vsub.f32 %v1064_v8, %v194_v18  ;;  %v487_v21 = vpop.eup %486  ;;  %v247_v53 = vsub.f32 1.0, %v239_v62  ;;  %v252_v16 = vmul.f32 %v244_v59, %v706_v19  ;;  %v256_v26 = vadd.f32 %v248_v49, %v680_v56 }
  0x2c   :  { %v788_v36 = vsub.f32 %v1065_v12, %v195_v27  ;;  %v1066_v4 = vmax.f32 %v626_v6, 0.0  ;;  %v253_v5 = vmul.f32 %v245_v58, %v708_v20  ;;  %v254_v27 = vmul.f32 %v246_v57, %v724_v32 }
  0x2d   :  { %v257_v37 = vadd.f32 %v249_v55, %v685_v61  ;;  %v183_v31 = vsel %vm167_vm7, %v742_v51, %v175_v2  ;;  %v1068_v62 = vmax.f32 %v628_v7, 0.0  ;;  %v811_v56 = vmul.f32 0.6931472, %v483_v54 }
  0x2e   :  { %v798_v18 = vsub.f32 %v1066_v4, %v196_v29  ;;  %v258_v6 = vadd.f32 %v250_v52, %v694_v11  ;;  %v489_v29 = vpop.eup %488  ;;  %v814_v41 = vmul.f32 0.6931472, %v485_v60  ;;  %v816_v58 = vmul.f32 0.6931472, %v487_v21 }
  0x2f   :  { %v809_v63 = vsub.f32 %v1068_v62, %v721_v30  ;;  %494 = vlog2.f32 %v182_v3  ;;  %v259_v57 = vadd.f32 %v251_v35, %v710_v25  ;;  %v491_v61 = vpop.eup %490  ;;  %v1069_v42 = vmax.f32 %v631_v9, 0.0 }
  0x30   :  { %1067 = vst [vmem:[#allocation16_spill] sm:$0xff] %v798_v18  ;;  %v255_v7 = vmul.f32 %v247_v53, %v752_v14  ;;  %v260_v54 = vadd.f32 %v252_v16, %v715_v28  ;;  %v825_v30 = vmax.f32 %v256_v26, 0.0  ;;  %v493_v11 = vpop.eup %492  ;;  %v1070_v49 = vmax.f32 %v637_v17, 0.0 }
  0x31   :  { %v821_v59 = vsub.f32 %v1069_v42, %v198_v48  ;;  %v261_v2 = vadd.f32 %v253_v5, %v726_v33  ;;  %v262_v25 = vadd.f32 %v254_v27, %v728_v34  ;;  %v833_v52 = vmax.f32 %v257_v37, 0.0 }
  0x32   :  { %v829_v55 = vsub.f32 %v1070_v49, %v199_v15  ;;  %v835_v9 = vmul.f32 0.6931472, %v489_v29  ;;  %496 = vlog2.f32 %v183_v31  ;;  %v839_v28 = vmax.f32 %v258_v6, 0.0 }
  0x33   :  { %v841_v60 = vmul.f32 0.6931472, %v491_v61  ;;  %v847_v33 = vmax.f32 %v259_v57, 0.0  ;;  %v849_v34 = vmul.f32 0.6931472, %v493_v11  ;;  %v263_v8 = vadd.f32 %v255_v7, %v742_v51 }
  0x34   :  { %1071 = vst [vmem:[#allocation17_spill] sm:$0xff] %v829_v55  ;;  %v852_v12 = vmax.f32 %v260_v54, 0.0  ;;  %498 = vrsqrt.f32 %v825_v30  ;;  %v855_v21 = vmax.f32 %v261_v2, 0.0  ;;  %v857_v3 = vmax.f32 %v262_v25, 0.0 }
  0x35   :  { %1072 = vst [vmem:[#allocation18_spill] sm:$0xff] %v841_v60  ;;  %v495_v35 = vpop.eup %494  ;;  %v272_v53 = vmul.f32 -0.5, %v668_v46  ;;  %500 = vrsqrt.f32 %v833_v52  ;;  %v273_v16 = vmul.f32 -0.5, %v690_v0  ;;  %v274_v26 = vmul.f32 -0.5, %v692_v1 }
  0x36   :  { %v275_v4 = vmul.f32 -0.5, %v698_v13  ;;  %502 = vrsqrt.f32 %v839_v28  ;;  %v276_v51 = vmul.f32 -0.5, %v706_v19  ;;  %v277_v5 = vmul.f32 -0.5, %v708_v20 }
  0x37   :  { %v278_v27 = vmul.f32 -0.5, %v724_v32  ;;  %504 = vrsqrt.f32 %v847_v33  ;;  %v871_v46 = vmul.f32 0.6931472, %v495_v35  ;;  %v875_v1 = vmax.f32 %v263_v8, 0.0 }
  0x38   :  { %v869_v37 = vpop.eup %496  ;;  %506 = vrsqrt.f32 %v852_v12  ;;  %v881_v19 = vmul.f32 -0.5, %v752_v14  ;;  %v883_v20 = vadd.f32 0.75, %v272_v53  ;;  %v886_v31 = vadd.f32 0.75, %v273_v16 }
  0x39   :  { %508 = vrsqrt.f32 %v855_v21  ;;  %v888_v62 = vadd.f32 0.75, %v274_v26  ;;  %v890_v6 = vadd.f32 0.75, %v275_v4  ;;  %v893_v57 = vadd.f32 0.75, %v276_v51 }
  0x3a   :  { %v499_v32 = vpop.eup %498  ;;  %510 = vrsqrt.f32 %v857_v3  ;;  %v895_v61 = vadd.f32 0.75, %v277_v5  ;;  %v897_v14 = vadd.f32 0.75, %v278_v27  ;;  %vm295_vm8 = vcmp.eq.f32.partialorder %v825_v30, inf }
  0x3b   :  { %v501_v29 = vpop.eup %500  ;;  %v289_v42 = vmul.f32 %v499_v32, %v825_v30  ;;  %512 = vrsqrt.f32 %v875_v1  ;;  %vm297_vm9 = vcmp.eq.f32.partialorder %v825_v30, 0.0  ;;  %vm307_vm10 = vcmp.eq.f32.partialorder %v833_v52, inf }
  0x3c   :  { %v503_v7 = vpop.eup %502  ;;  %v301_v11 = vmul.f32 %v501_v29, %v833_v52  ;;  %vm309_vm11 = vcmp.eq.f32.partialorder %v833_v52, 0.0  ;;  %vm319_vm12 = vcmp.eq.f32.partialorder %v839_v28, inf  ;;  %vm321_vm13 = vcmp.eq.f32.partialorder %v839_v28, 0.0 }
  0x3d   :  { %v505_v49 = vpop.eup %504  ;;  %v290_v2 = vmul.f32 %v499_v32, %v289_v42  ;;  %v313_v8 = vmul.f32 %v503_v7, %v839_v28  ;;  %vm331_vm14 = vcmp.eq.f32.partialorder %v847_v33, inf  ;;  %vm333_vm15 = vcmp.eq.f32.partialorder %v847_v33, 0.0 }
  0x3e   :  { %v507_v53 = vpop.eup %506  ;;  %v302_v16 = vmul.f32 %v501_v29, %v301_v11  ;;  %v325_v26 = vmul.f32 %v505_v49, %v847_v33  ;;  %vm343_vm0 = vcmp.eq.f32.partialorder %v852_v12, inf  ;;  %vm345_vm1 = vcmp.eq.f32.partialorder %v852_v12, 0.0 }
  0x3f   :  { %v509_v5 = vpop.eup %508  ;;  %v291_v27 = vmul.f32 0.5, %v290_v2  ;;  %v314_v42 = vmul.f32 %v503_v7, %v313_v8  ;;  %v337_v13 = vmul.f32 %v507_v53, %v852_v12  ;;  %v370_v2 = vand.u32 2147483648, %v857_v3 }
  0x40   :  { %v511_v0 = vpop.eup %510  ;;  %v303_v15 = vmul.f32 0.5, %v302_v16  ;;  %v326_v17 = vmul.f32 %v505_v49, %v325_v26  ;;  %v349_v48 = vmul.f32 %v509_v5, %v855_v21  ;;  %vm355_vm2 = vcmp.eq.f32.partialorder %v855_v21, inf }
  0x41   :  { %v292_v8 = vsub.f32 1.5, %v291_v27  ;;  %v315_v51 = vmul.f32 0.5, %v314_v42  ;;  %v338_v4 = vmul.f32 %v507_v53, %v337_v13  ;;  %v361_v11 = vmul.f32 %v511_v0, %v857_v3  ;;  %v513_v35 = vpop.eup %512 }
  0x42   :  { %v304_v16 = vsub.f32 1.5, %v303_v15  ;;  %v327_v26 = vmul.f32 0.5, %v326_v17  ;;  %v350_v25 = vmul.f32 %v509_v5, %v349_v48  ;;  %vm357_vm3 = vcmp.eq.f32.partialorder %v855_v21, 0.0 }
  0x43   :  { %vm367_vm4 = vcmp.eq.f32.partialorder %v857_v3, inf  ;;  %v293_v45 = vmul.f32 %v499_v32, %v292_v8  ;;  %v316_v27 = vsub.f32 1.5, %v315_v51  ;;  %v339_v42 = vmul.f32 0.5, %v338_v4 }
  0x44   :  { %v362_v13 = vmul.f32 %v511_v0, %v361_v11  ;;  %vm369_vm5 = vcmp.eq.f32.partialorder %v857_v3, 0.0  ;;  %v305_v24 = vmul.f32 %v501_v29, %v304_v16  ;;  %v328_v55 = vsub.f32 1.5, %v327_v26 }
  0x45   :  { %v351_v44 = vmul.f32 0.5, %v350_v25  ;;  %v373_v22 = vmul.f32 %v513_v35, %v875_v1  ;;  %v294_v17 = vmul.f32 %v293_v45, %v825_v30  ;;  %v317_v48 = vmul.f32 %v503_v7, %v316_v27 }
  0x46   :  { %v340_v15 = vsub.f32 1.5, %v339_v42  ;;  %v363_v23 = vmul.f32 0.5, %v362_v13  ;;  %v306_v60 = vmul.f32 %v305_v24, %v833_v52  ;;  %v329_v18 = vmul.f32 %v505_v49, %v328_v55 }
  0x47   :  { %v352_v54 = vsub.f32 1.5, %v351_v44  ;;  %v374_v32 = vmul.f32 %v513_v35, %v373_v22  ;;  %v296_v4 = vsel %vm295_vm8, %v825_v30, %v294_v17  ;;  %v318_v29 = vmul.f32 %v317_v48, %v839_v28 }
  0x48   :  { %v341_v51 = vmul.f32 %v507_v53, %v340_v15  ;;  %v364_v25 = vsub.f32 1.5, %v363_v23  ;;  %vm379_vm6 = vcmp.eq.f32.partialorder %v875_v1, inf  ;;  %v1073_v45 = vand.u32 2147483648, %v825_v30 }
  0x49   :  { %v308_v24 = vsel %vm307_vm10, %v833_v52, %v306_v60  ;;  %v330_v22 = vmul.f32 %v329_v18, %v847_v33  ;;  %v353_v44 = vmul.f32 %v509_v5, %v352_v54  ;;  %vm381_vm7 = vcmp.eq.f32.partialorder %v875_v1, 0.0 }
  0x4a   :  { %v299_v7 = vsel %vm297_vm9, %v1073_v45, %v296_v4  ;;  %v1074_v55 = vand.u32 2147483648, %v833_v52  ;;  %v320_v49 = vsel %vm319_vm12, %v839_v28, %v318_v29  ;;  %v342_v53 = vmul.f32 %v341_v51, %v852_v12 }
  0x4b   :  { %v365_v11 = vmul.f32 %v511_v0, %v364_v25  ;;  %v1075_v8 = vand.u32 2147483648, %v839_v28  ;;  %v332_v60 = vsel %vm331_vm14, %v847_v33, %v330_v22  ;;  %v354_v54 = vmul.f32 %v353_v44, %v855_v21 }
  0x4c   :  { %v311_v23 = vsel %vm309_vm11, %v1074_v55, %v308_v24  ;;  %v375_v5 = vmul.f32 0.5, %v374_v32  ;;  %v1076_v16 = vand.u32 2147483648, %v847_v33  ;;  %v344_v0 = vsel %vm343_vm0, %v852_v12, %v342_v53 }
  0x4d   :  { %v323_v18 = vsel %vm321_vm13, %v1075_v8, %v320_v49  ;;  %v366_v27 = vmul.f32 %v365_v11, %v857_v3  ;;  %v384_v42 = vmul.f32 %v299_v7, %v825_v30  ;;  %v1077_v13 = vand.u32 2147483648, %v852_v12  ;;  %v1085_v49 = vld [vmem:[#allocation18_spill] sm:$0xff]  ;;  %v1087_v11 = vld [vmem:[#allocation12_spill] sm:$0xff]  ;;  %v1089_v8 = vld [vmem:[#allocation11_spill] sm:$0xff] }
  0x4e   :  { %v335_v26 = vsel %vm333_vm15, %v1076_v16, %v332_v60  ;;  %v356_v48 = vsel %vm355_vm2, %v855_v21, %v354_v54  ;;  %v376_v15 = vsub.f32 1.5, %v375_v5  ;;  %v385_v32 = vmul.f32 %v311_v23, %v833_v52  ;;  %v1091_v60 = vld [vmem:[#allocation17_spill] sm:$0xff] }
  0x4f   :  { %v347_v17 = vsel %vm345_vm1, %v1077_v13, %v344_v0  ;;  %v1078_v4 = vand.u32 2147483648, %v855_v21  ;;  %v368_v30 = vsel %vm367_vm4, %v857_v3, %v366_v27  ;;  %v386_v51 = vmul.f32 %v323_v18, %v839_v28  ;;  %v1090_v18 = vld [vmem:[#allocation14_spill] sm:$0xff] }
  0x50   :  { %v387_v25 = vmul.f32 %v335_v26, %v847_v33  ;;  %v371_v45 = vsel %vm369_vm5, %v370_v2, %v368_v30  ;;  %v377_v7 = vmul.f32 %v513_v35, %v376_v15  ;;  %v388_v24 = vmul.f32 %v347_v17, %v852_v12  ;;  %v1094_v26 = vld [vmem:[#allocation15_spill] sm:$0xff] }
  0x51   :  { %v359_v29 = vsel %vm357_vm3, %v1078_v4, %v356_v48  ;;  %vm412_vm8 = vcmp.lt.s32.totalorder %v651_v38, 2048  ;;  %v392_v22 = vmul.f32 %v384_v42, %v883_v20  ;;  %v393_v44 = vmul.f32 %v385_v32, %v886_v31 }
  0x52   :  { %v389_v52 = vmul.f32 %v359_v29, %v855_v21  ;;  %v394_v55 = vmul.f32 %v386_v51, %v888_v62  ;;  %v378_v28 = vmul.f32 %v377_v7, %v875_v1  ;;  %v390_v33 = vmul.f32 %v371_v45, %v857_v3 }
  0x53   :  { %v395_v23 = vmul.f32 %v387_v25, %v890_v6  ;;  %vm413_vm9 = vcmp.lt.s32.totalorder %v654_v39, 2048  ;;  %v396_v12 = vmul.f32 %v388_v24, %v893_v57  ;;  %v1079_v35 = vsub.f32 %v768_v47, %v811_v56 }
  0x54   :  { %v1080_v20 = vsub.f32 %v779_v50, %v814_v41  ;;  %v1081_v62 = vsub.f32 %v784_v10, %v816_v58  ;;  %v223_v3 = vmul.f32 0.6931472, %v869_v37  ;;  %v229_v6 = vsub.f32 %v809_v63, %v849_v34 }
  0x55   :  { %v400_v21 = vmul.f32 %v392_v22, %v1079_v35  ;;  %v380_v57 = vsel %vm379_vm6, %v875_v1, %v378_v28  ;;  %vm414_vm10 = vcmp.lt.s32.totalorder %v657_v40, 2048  ;;  %v287_v47 = vadd.f32 0.75, %v881_v19 }
  0x56   :  { %v401_v31 = vmul.f32 %v393_v44, %v1080_v20  ;;  %v402_v2 = vmul.f32 %v394_v55, %v1081_v62  ;;  %v1082_v50 = vand.u32 2147483648, %v875_v1  ;;  %v397_v10 = vmul.f32 %v389_v52, %v895_v61  ;;  %v1084_v61 = vld [vmem:[#allocation16_spill] sm:$0xff] }
  0x57   :  { %v1083_v41 = vsub.f32 %v788_v36, %v835_v9  ;;  %vm415_vm11 = vcmp.lt.s32.totalorder %v660_v43, 2048  ;;  %v420_v40 = vsel %vm412_vm8, %v400_v21, 0.0  ;;  %v230_v37 = vsub.f32 %v821_v59, %v871_v46  ;;  %v1092_v59 = vld [vmem:[#allocation13_spill] sm:$0xff] }
  0x58   :  { %v383_v56 = vsel %vm381_vm7, %v1082_v50, %v380_v57  ;;  %v421_v34 = vsel %vm413_vm9, %v401_v31, 0.0  ;;  %v398_v19 = vmul.f32 %v390_v33, %v897_v14  ;;  %v1086_v53 = vsub.f32 %v1084_v61, %v1085_v49 }
  0x59   :  { %v403_v58 = vmul.f32 %v395_v23, %v1083_v41  ;;  %v391_v63 = vmul.f32 %v383_v56, %v875_v1  ;;  %v422_v9 = vsel %vm414_vm10, %v402_v2, 0.0  ;;  %v1088_v1 = vmul.u32 128, %v1087_v11 }
  0x5a   :  { %v404_v36 = vmul.f32 %v396_v12, %v1086_v53  ;;  %vm416_vm12 = vcmp.lt.s32.totalorder %v1090_v18, 2048  ;;  %v429_v38 = vadd.f32 %v421_v34, %v420_v40  ;;  %v231_v39 = vsub.f32 %v1091_v60, %v223_v3 }
  0x5b   :  { %v110_v43 = vadd.s32 %v1089_v8, %v1088_v1  ;;  %v399_v54 = vmul.f32 %v391_v63, %v287_v47  ;;  %v405_v5 = vmul.f32 %v397_v10, %v229_v6  ;;  %v423_v16 = vsel %vm415_vm11, %v403_v58, 0.0 }
  0x5c   :  { %v1093_v46 = vmul.u32 128, %v1092_v59  ;;  %vm417_vm13 = vcmp.lt.s32.totalorder %v1094_v26, 2048  ;;  %v430_v0 = vadd.f32 %v429_v38, %v422_v9  ;;  %v406_v27 = vmul.f32 %v398_v19, %v230_v37 }
  0x5d   :  { %v424_v42 = vsel %vm416_vm12, %v404_v36, 0.0  ;;  %vm418_vm14 = vcmp.lt.s32.totalorder %v110_v43, 2048  ;;  %v407_v17 = vmul.f32 %v399_v54, %v231_v39  ;;  %v425_v48 = vsel %vm417_vm13, %v405_v5, 0.0 }
  0x5e   :  { %v111_v14 = vadd.s32 %v1089_v8, %v1093_v46  ;;  %v431_v13 = vadd.f32 %v430_v0, %v423_v16  ;;  %v426_v32 = vsel %vm418_vm14, %v406_v27, 0.0 }
  0x60   :  { %vm419_vm15 = vcmp.lt.s32.totalorder %v111_v14, 2048  ;;  %v432_v15 = vadd.f32 %v431_v13, %v424_v42 }
  0x61   :  { %v427_v29 = vsel %vm419_vm15, %v407_v17, 0.0 }
  0x62   :  { %v433_v4 = vadd.f32 %v432_v15, %v425_v48 }
  0x64   :  { %v434_v30 = vadd.f32 %v433_v4, %v426_v32 }
  0x66   :  { %v435_v51 = vadd.f32 %v434_v30, %v427_v29 }
  0x68   :  { %437 = vst [vmem:[#allocation7] sm:$0xff] %v435_v51 }
  0x69   :  { %448 = dma.vmem_to_hbm [thread:$0]  %s444_s1, 128, %s446_s23, [#allocation4]  }
  0x6a   :  { %590 = dma.done.wait [#allocation4], 128  }
  0x6b   :  { %591 = vsyncadd [#allocation4], 4294967168 }
  0x6c   :  { %453 = vsyncpa [#allocation3], 1 }
  0x6d   :  { %454 = vsyncpa [#allocation6], 1 }
  0x6e   :  { %455 = vsyncpa [#allocation4], 1 }

</bundles_post_ra>
